<compile_context>
chip_gen: v7x
topology: tpu7x:2x2x1
jax: 0.10.0
libtpu: 0.0.40
codegen_flags: <defaults>
</compile_context>

<pallas_src>
import math
import functools

import numpy as np
import jax
import jax.numpy as jnp
from jax.experimental import pallas as pl
from jax.experimental.pallas import tpu as pltpu


_LANE = 128
_SUBLANE = 8
_OUT_PAD = 128          # lane-dense padded width of the 2-logit output


def _round_up(x, m):
    return (x + m - 1) // m * m


# ------------------------------------------------------------------- kernel --

def _disc_fused_kernel(emb_ref, wtap_ref, cbias_ref, limit_ref,
                       wh_ref, bh_ref, w2_ref, b2_ref, out_ref,
                       *, k_max, s_pool):
    """Fused discriminator forward for one batch block.

    emb_ref  : (B_blk, T_in, E)      bf16  per-sample time axis, zero-padded tail
    wtap_ref : (k_max*E, F_pad)      bf16  conv weights, taps stacked along K
    cbias_ref: (1, F_pad)            f32   concatenated conv biases
    limit_ref: (1, F_pad)            i32   valid pool length per channel (S - k_c + 1)
    wh_ref   : (F_pad, F_pad)        bf16  highway weight;  bh_ref (1, F_pad) f32 bias
    w2_ref   : (F_pad, OUT_PAD)      bf16  output weight;   b2_ref (1, OUT_PAD) f32 bias
    out_ref  : (B_blk, OUT_PAD)      f32   padded logits
    """
    b_blk, t_in, e = emb_ref.shape
    f_pad = cbias_ref.shape[1]

    emb = emb_ref[...]                                       # (B_blk, T_in, E) bf16

    # Conv2d(1, C, (k, E)) for every filter size in ONE MXU pass: lane-concat
    # the k_max shifted time slices so the contraction depth is K = k_max*E.
    win = jnp.concatenate([emb[:, j:j + s_pool, :] for j in range(k_max)],
                          axis=-1)                           # (B_blk, S_pool, k_max*E)
    win = win.reshape(b_blk * s_pool, k_max * e)
    acc = jnp.dot(win, wtap_ref[...],
                  preferred_element_type=jnp.float32)        # (B_blk*S_pool, F_pad) f32

    # Bias + ReLU (f32 VPU), then zero invalid pool positions (t >= S - k_c + 1)
    # and padded channels before the time max.  ReLU output >= 0, so masking
    # with 0 never changes the max (NOTE: load-bearing; only valid for ReLU).
    z = jnp.maximum(acc + cbias_ref[...], 0.0)
    z = z.reshape(b_blk, s_pool, f_pad)
    t_idx = jax.lax.broadcasted_iota(jnp.int32, (s_pool, f_pad), 0)
    valid = t_idx < limit_ref[...]                           # (S_pool, F_pad) bool
    z = jnp.where(valid[None, :, :], z, 0.0)
    pooled = jnp.max(z, axis=1)                              # (B_blk, F_pad)  max-pool

    # Highway:  pred = f + sigmoid(h) * (relu(h) - f)
    h = jnp.dot(pooled.astype(wh_ref.dtype), wh_ref[...],
                preferred_element_type=jnp.float32) + bh_ref[...]
    sig = jax.nn.sigmoid(h)                                  # EUP
    pred = pooled + sig * (jnp.maximum(h, 0.0) - pooled)

    # Dropout = identity (eval).  Final linear head, lane-dense padded output.
    out_ref[...] = jnp.dot(pred.astype(w2_ref.dtype), w2_ref[...],
                           preferred_element_type=jnp.float32) + b2_ref[...]


# -------------------------------------------------------------------- model --

class DiscriminatorPallas:
    def __init__(self, embedding_dim, vocab_size, filter_sizes, num_filters,
                 padding_idx, dropout=0.25, seed=0):
        assert len(filter_sizes) == len(num_filters)
        self.embedding_dim = int(embedding_dim)
        self.vocab_size = int(vocab_size)
        self.filter_sizes = [int(k) for k in filter_sizes]
        self.num_filters = [int(c) for c in num_filters]
        self.padding_idx = int(padding_idx)
        self.feature_dim = sum(self.num_filters)
        self.k_max = max(self.filter_sizes)
        self.f_pad = _round_up(self.feature_dim, _LANE)

        E = self.embedding_dim
        F = self.feature_dim
        F_pad = self.f_pad
        KE = self.k_max * E

        key = jax.random.PRNGKey(seed)
        ks = jax.random.split(key, 5 + 2 * len(self.filter_sizes))

        # ---- f32 master parameters (init_params: std = 1/sqrt(shape[0])) ----
        emb_std = 1.0 / math.sqrt(self.vocab_size)
        emb = emb_std * jax.random.normal(ks[0], (self.vocab_size, E), jnp.float32)
        emb = emb.at[self.padding_idx].set(0.0)              # nn.Embedding padding_idx
        self._emb_f32 = emb

        self._conv_w_f32 = []                                 # (k*E, C) per filter size
        self._conv_b_f32 = []
        for i, (c, k) in enumerate(zip(self.num_filters, self.filter_sizes)):
            std = 1.0 / math.sqrt(c)
            w = std * jax.random.normal(ks[1 + 2 * i], (c, 1, k, E), jnp.float32)
            b = std * jax.random.normal(ks[2 + 2 * i], (c,), jnp.float32)
            self._conv_w_f32.append(w.reshape(c, k * E).T)    # rows ordered (tap, e)
            self._conv_b_f32.append(b)

        hw_std = 1.0 / math.sqrt(F)
        self._wh_f32 = hw_std * jax.random.normal(ks[-4], (F, F), jnp.float32)
        self._bh_f32 = hw_std * jax.random.normal(ks[-3], (F,), jnp.float32)
        out_std = 1.0 / math.sqrt(2)
        self._w2_f32 = out_std * jax.random.normal(ks[-2], (F, 2), jnp.float32)
        self._b2_f32 = out_std * jax.random.normal(ks[-1], (2,), jnp.float32)

        # ---- packed / padded kernel parameters (lane-dense, zero padded) ----
        wtap = np.zeros((KE, F_pad), np.float32)              # taps stacked along K
        cbias = np.zeros((1, F_pad), np.float32)
        col_k = np.full((F_pad,), 10 ** 6, np.int32)          # padded channels: never valid
        off = 0
        for (c, k), w2d, b in zip(zip(self.num_filters, self.filter_sizes),
                                  self._conv_w_f32, self._conv_b_f32):
            wtap[:k * E, off:off + c] = np.asarray(w2d)       # (k*E, c)
            cbias[0, off:off + c] = np.asarray(b)
            col_k[off:off + c] = k
            off += c

        wh_p = np.zeros((F_pad, F_pad), np.float32)
        wh_p[:F, :F] = np.asarray(self._wh_f32)
        bh_p = np.zeros((1, F_pad), np.float32)
        bh_p[0, :F] = np.asarray(self._bh_f32)
        w2_p = np.zeros((F_pad, _OUT_PAD), np.float32)
        w2_p[:F, :2] = np.asarray(self._w2_f32)
        b2_p = np.zeros((1, _OUT_PAD), np.float32)
        b2_p[0, :2] = np.asarray(self._b2_f32)

        # bf16 for MXU operands, f32 accumulation in-kernel; biases stay f32.
        self.emb_table = self._emb_f32.astype(jnp.bfloat16)
        self.wtap = jnp.asarray(wtap, jnp.bfloat16)
        self.cbias = jnp.asarray(cbias, jnp.float32)
        self.col_k = jnp.asarray(col_k, jnp.int32)
        self.wh = jnp.asarray(wh_p, jnp.bfloat16)
        self.bh = jnp.asarray(bh_p, jnp.float32)
        self.w2 = jnp.asarray(w2_p, jnp.bfloat16)
        self.b2 = jnp.asarray(b2_p, jnp.float32)

    # ------------------------------------------------------- VMEM sizing ----
    def _vmem_bytes(self, b_blk, s_pool, t_in):
        E, F_pad = self.embedding_dim, self.f_pad
        KE = self.k_max * E
        emb = 2 * b_blk * t_in * E * 2                # double-buffered bf16 block
        win = b_blk * s_pool * KE * 2                 # in-kernel windowed LHS (bf16)
        act = 2 * b_blk * s_pool * F_pad * 4          # f32 conv acc + masked copy
        outb = 2 * b_blk * _OUT_PAD * 4
        wts = 2 * ((KE + F_pad + _OUT_PAD) * F_pad * 2 + (3 * F_pad + _OUT_PAD) * 4)
        small = 4 * b_blk * F_pad * 4                 # pooled / highway temporaries
        return emb + win + act + outb + wts + small

    def _pick_batch_block(self, B, s_pool, t_in, budget=16 << 20):
        """Largest 8-multiple batch block whose working set fits the budget."""
        best = _SUBLANE
        cap = min(512, _round_up(B, _SUBLANE))
        b = _SUBLANE
        while b <= cap:
            if self._vmem_bytes(b, s_pool, t_in) <= budget:
                best = b
            b *= 2
        return best

    # ----------------------------------------------------------- forward ----
    def __call__(self, inp):
        B, S = inp.shape
        E = self.embedding_dim
        F_pad = self.f_pad
        S_pool = _round_up(S, _SUBLANE)
        T_in = S_pool + self.k_max - 1
        B_blk = self._pick_batch_block(B, S_pool, T_in)
        B_pad = _round_up(B, B_blk)
        n_blk = B_pad // B_blk

        # Pad the cheap int32 index tensor (not the gathered bf16 embeddings):
        # padding positions use padding_idx, whose embedding row is zero, so a
        # single gather yields the already-padded (B_pad, T_in, E) slab.
        inp_full = jnp.full((B_pad, T_in), self.padding_idx, dtype=jnp.int32)
        inp_full = jax.lax.dynamic_update_slice(inp_full, inp.astype(jnp.int32), (0, 0))
        # Embedding gather stays in XLA (data-dependent gather); everything
        # after it runs in one fused, batch-blocked Pallas kernel.
        emb = jnp.take(self.emb_table, inp_full, axis=0)       # (B_pad, T_in, E) bf16

        # Per-channel count of valid pool positions: t valid iff t < S - k_c + 1.
        limit = (S - self.col_k + 1).reshape(1, F_pad)          # (1, F_pad) int32

        est = self._vmem_bytes(B_blk, S_pool, T_in)
        vmem_limit = int(min(max(2 * est, 32 << 20), 48 << 20))

        out = pl.pallas_call(
            functools.partial(_disc_fused_kernel, k_max=self.k_max, s_pool=S_pool),
            out_shape=jax.ShapeDtypeStruct((B_pad, _OUT_PAD), jnp.float32),
            grid=(n_blk,),
            in_specs=[
                # activation stream: blocked over the batch axis (pipelined)
                pl.BlockSpec((B_blk, T_in, E), lambda i: (i, 0, 0)),
                # weights / small constants: constant index_map -> VMEM resident
                pl.BlockSpec((self.k_max * E, F_pad), lambda i: (0, 0)),
                pl.BlockSpec((1, F_pad), lambda i: (0, 0)),
                pl.BlockSpec((1, F_pad), lambda i: (0, 0)),
                pl.BlockSpec((F_pad, F_pad), lambda i: (0, 0)),
                pl.BlockSpec((1, F_pad), lambda i: (0, 0)),
                pl.BlockSpec((F_pad, _OUT_PAD), lambda i: (0, 0)),
                pl.BlockSpec((1, _OUT_PAD), lambda i: (0, 0)),
            ],
            out_specs=pl.BlockSpec((B_blk, _OUT_PAD), lambda i: (i, 0)),
            compiler_params=pltpu.CompilerParams(
                dimension_semantics=("parallel",),
                vmem_limit_bytes=vmem_limit),
        )(emb, self.wtap, self.cbias, limit,
          self.wh, self.bh, self.w2, self.b2)
        return out[:B, :2]

    # --------------------------------------------- pure-JAX f32 reference ---
    def reference_forward(self, inp):
        emb = jnp.take(self._emb_f32, inp, axis=0)              # (B, S, E)
        B, S, E = emb.shape
        pools = []
        for k, w2d, b in zip(self.filter_sizes, self._conv_w_f32, self._conv_b_f32):
            L = S - k + 1
            wins = jnp.stack([emb[:, t:t + k, :].reshape(B, k * E) for t in range(L)],
                             axis=1)                            # (B, L, k*E)
            s = jnp.einsum("blk,kc->blc", wins, w2d) + b[None, None, :]
            pools.append(jnp.max(jnp.maximum(s, 0.0), axis=1))  # (B, C)
        f = jnp.concatenate(pools, axis=1)                      # (B, F)
        h = f @ self._wh_f32 + self._bh_f32[None, :]
        sig = jax.nn.sigmoid(h)
        pred = sig * jnp.maximum(h, 0.0) + (1.0 - sig) * f
        return pred @ self._w2_f32 + self._b2_f32[None, :]


# ---------------------------------------------------------------------- main --

if __name__ == "__main__":
    batch = 2
    seq_len = 8
    embedding_dim = 16
    vocab_size = 50
    padding_idx = 0
    filter_sizes = [2, 3, 4]
    num_filters = [32, 32, 64]     # feature_dim = 128 (lane-dense)

    model = DiscriminatorPallas(embedding_dim, vocab_size, filter_sizes,
                                num_filters, padding_idx, seed=0)

    key = jax.random.PRNGKey(0)
    inp = jax.random.randint(key, (batch, seq_len), 0, vocab_size, dtype=jnp.int32)

    pred = model(inp)                      # (batch, 2)
    pred = jax.block_until_ready(pred)
    assert pred.shape == (batch, 2)
    assert pred.dtype == jnp.float32
    assert bool(jnp.all(jnp.isfinite(pred)))

    # Loose tolerance: kernel uses bf16 MXU operands with f32 accumulation.
    ref = model.reference_forward(inp)
    assert bool(jnp.allclose(pred, ref, rtol=1e-1, atol=1.5e-1)), (pred, ref)
    print("KERNEL_OK")
</pallas_src>

<mosaic_0001>
module attributes {stable_mosaic.version = 11 : i64} {
  func.func @_disc_fused_kernel(%arg0: i32, %arg1: memref<8x11x16xbf16, #tpu.memory_space<vmem>>, %arg2: memref<64x128xbf16, #tpu.memory_space<vmem>>, %arg3: memref<1x128xf32, #tpu.memory_space<vmem>>, %arg4: memref<1x128xi32, #tpu.memory_space<vmem>>, %arg5: memref<128x128xbf16, #tpu.memory_space<vmem>>, %arg6: memref<1x128xf32, #tpu.memory_space<vmem>>, %arg7: memref<128x128xbf16, #tpu.memory_space<vmem>>, %arg8: memref<1x128xf32, #tpu.memory_space<vmem>>, %arg9: memref<8x128xf32, #tpu.memory_space<vmem>>) attributes {dimension_semantics = [#tpu.dimension_semantics<parallel>], iteration_bounds = array<i64: 1>, scalar_prefetch = 0 : i64, scratch_operands = 0 : i64, tpu.core_type = #tpu.core_type<tc>, window_params = [{transform_indices = @transform_0, window_bounds = array<i64: 8, 11, 16>}, {pipeline_mode = #tpu.pipeline_mode<synchronous>, transform_indices = @transform_1, window_bounds = array<i64: 64, 128>}, {pipeline_mode = #tpu.pipeline_mode<synchronous>, transform_indices = @transform_2, window_bounds = array<i64: 1, 128>}, {pipeline_mode = #tpu.pipeline_mode<synchronous>, transform_indices = @transform_3, window_bounds = array<i64: 1, 128>}, {pipeline_mode = #tpu.pipeline_mode<synchronous>, transform_indices = @transform_4, window_bounds = array<i64: 128, 128>}, {pipeline_mode = #tpu.pipeline_mode<synchronous>, transform_indices = @transform_5, window_bounds = array<i64: 1, 128>}, {pipeline_mode = #tpu.pipeline_mode<synchronous>, transform_indices = @transform_6, window_bounds = array<i64: 128, 128>}, {pipeline_mode = #tpu.pipeline_mode<synchronous>, transform_indices = @transform_7, window_bounds = array<i64: 1, 128>}, {transform_indices = @transform_8, window_bounds = array<i64: 8, 128>}]} {
    %c0 = arith.constant 0 : index
    %c0_0 = arith.constant 0 : index
    %c0_1 = arith.constant 0 : index
    %0 = vector.load %arg1[%c0, %c0_0, %c0_1] : memref<8x11x16xbf16, #tpu.memory_space<vmem>>, vector<8x11x16xbf16>
    %1 = vector.extract_strided_slice %0 {offsets = [0, 0, 0], sizes = [8, 8, 16], strides = [1, 1, 1]} : vector<8x11x16xbf16> to vector<8x8x16xbf16>
    %2 = vector.extract_strided_slice %0 {offsets = [0, 1, 0], sizes = [8, 8, 16], strides = [1, 1, 1]} : vector<8x11x16xbf16> to vector<8x8x16xbf16>
    %3 = vector.extract_strided_slice %0 {offsets = [0, 2, 0], sizes = [8, 8, 16], strides = [1, 1, 1]} : vector<8x11x16xbf16> to vector<8x8x16xbf16>
    %4 = vector.extract_strided_slice %0 {offsets = [0, 3, 0], sizes = [8, 8, 16], strides = [1, 1, 1]} : vector<8x11x16xbf16> to vector<8x8x16xbf16>
    %5 = tpu.concatenate %1, %2, %3, %4 in 2 : vector<8x8x16xbf16>, vector<8x8x16xbf16>, vector<8x8x16xbf16>, vector<8x8x16xbf16> -> vector<8x8x64xbf16>
    %6 = vector.shape_cast %5 : vector<8x8x64xbf16> to vector<64x64xbf16>
    %c0_2 = arith.constant 0 : index
    %c0_3 = arith.constant 0 : index
    %7 = vector.load %arg2[%c0_2, %c0_3] : memref<64x128xbf16, #tpu.memory_space<vmem>>, vector<64x128xbf16>
    %cst = arith.constant dense<0.000000e+00> : vector<64x128xf32>
    %8 = tpu.matmul %6, %7, %cst {dimension_numbers = #tpu.dot_dimension_numbers<[1], [0], [0], [1], [0, 0, 1, 1], [], []>} : vector<64x64xbf16>, vector<64x128xbf16>, vector<64x128xf32> -> vector<64x128xf32>
    %c0_4 = arith.constant 0 : index
    %c0_5 = arith.constant 0 : index
    %9 = vector.load %arg3[%c0_4, %c0_5] : memref<1x128xf32, #tpu.memory_space<vmem>>, vector<1x128xf32>
    %10 = vector.broadcast %9 : vector<1x128xf32> to vector<64x128xf32>
    %11 = arith.addf %8, %10 : vector<64x128xf32>
    %cst_6 = arith.constant 0.000000e+00 : f32
    %12 = vector.broadcast %cst_6 : f32 to vector<64x128xf32>
    %13 = arith.maximumf %11, %12 : vector<64x128xf32>
    %14 = vector.shape_cast %13 : vector<64x128xf32> to vector<8x8x128xf32>
    %15 = tpu.iota {dimensions = array<i32: 0>} : vector<8x128xi32>
    %c0_7 = arith.constant 0 : index
    %c0_8 = arith.constant 0 : index
    %16 = vector.load %arg4[%c0_7, %c0_8] : memref<1x128xi32, #tpu.memory_space<vmem>>, vector<1x128xi32>
    %17 = vector.broadcast %16 : vector<1x128xi32> to vector<8x128xi32>
    %18 = arith.cmpi slt, %15, %17 : vector<8x128xi32>
    %19 = vector.shape_cast %18 : vector<8x128xi1> to vector<1x8x128xi1>
    %cst_9 = arith.constant 0.000000e+00 : f32
    %20 = vector.shape_cast %19 : vector<1x8x128xi1> to vector<1x8x128xi1>
    %21 = vector.broadcast %20 : vector<1x8x128xi1> to vector<8x8x128xi1>
    %22 = vector.broadcast %cst_9 : f32 to vector<8x8x128xf32>
    %23 = arith.select %21, %14, %22 : vector<8x8x128xi1>, vector<8x8x128xf32>
    %cst_10 = arith.constant dense<0xFF800000> : vector<8x128xf32>
    %24 = vector.multi_reduction <maximumf>, %23, %cst_10 [1] : vector<8x8x128xf32> to vector<8x128xf32>
    %25 = arith.truncf %24 : vector<8x128xf32> to vector<8x128xbf16>
    %c0_11 = arith.constant 0 : index
    %c0_12 = arith.constant 0 : index
    %26 = vector.load %arg5[%c0_11, %c0_12] : memref<128x128xbf16, #tpu.memory_space<vmem>>, vector<128x128xbf16>
    %cst_13 = arith.constant dense<0.000000e+00> : vector<8x128xf32>
    %27 = tpu.matmul %25, %26, %cst_13 {dimension_numbers = #tpu.dot_dimension_numbers<[1], [0], [0], [1], [0, 0, 1, 1], [], []>} : vector<8x128xbf16>, vector<128x128xbf16>, vector<8x128xf32> -> vector<8x128xf32>
    %c0_14 = arith.constant 0 : index
    %c0_15 = arith.constant 0 : index
    %28 = vector.load %arg6[%c0_14, %c0_15] : memref<1x128xf32, #tpu.memory_space<vmem>>, vector<1x128xf32>
    %29 = vector.broadcast %28 : vector<1x128xf32> to vector<8x128xf32>
    %30 = arith.addf %27, %29 : vector<8x128xf32>
    %31 = arith.negf %30 : vector<8x128xf32>
    %32 = math.exp %31 : vector<8x128xf32>
    %cst_16 = arith.constant 1.000000e+00 : f32
    %33 = vector.broadcast %cst_16 : f32 to vector<8x128xf32>
    %34 = arith.addf %33, %32 : vector<8x128xf32>
    %35 = arith.divf %33, %34 : vector<8x128xf32>
    %cst_17 = arith.constant 0.000000e+00 : f32
    %36 = vector.broadcast %cst_17 : f32 to vector<8x128xf32>
    %37 = arith.maximumf %30, %36 : vector<8x128xf32>
    %38 = arith.subf %37, %24 : vector<8x128xf32>
    %39 = arith.mulf %35, %38 : vector<8x128xf32>
    %40 = arith.addf %24, %39 : vector<8x128xf32>
    %41 = arith.truncf %40 : vector<8x128xf32> to vector<8x128xbf16>
    %c0_18 = arith.constant 0 : index
    %c0_19 = arith.constant 0 : index
    %42 = vector.load %arg7[%c0_18, %c0_19] : memref<128x128xbf16, #tpu.memory_space<vmem>>, vector<128x128xbf16>
    %cst_20 = arith.constant dense<0.000000e+00> : vector<8x128xf32>
    %43 = tpu.matmul %41, %42, %cst_20 {dimension_numbers = #tpu.dot_dimension_numbers<[1], [0], [0], [1], [0, 0, 1, 1], [], []>} : vector<8x128xbf16>, vector<128x128xbf16>, vector<8x128xf32> -> vector<8x128xf32>
    %c0_21 = arith.constant 0 : index
    %c0_22 = arith.constant 0 : index
    %44 = vector.load %arg8[%c0_21, %c0_22] : memref<1x128xf32, #tpu.memory_space<vmem>>, vector<1x128xf32>
    %45 = vector.broadcast %44 : vector<1x128xf32> to vector<8x128xf32>
    %46 = arith.addf %43, %45 : vector<8x128xf32>
    %c0_23 = arith.constant 0 : index
    %c0_24 = arith.constant 0 : index
    %47 = vector.load %arg9[%c0_23, %c0_24] : memref<8x128xf32, #tpu.memory_space<vmem>>, vector<8x128xf32>
    tpu.vector_store %arg9[%c0_23, %c0_24], %46 {strides = array<i32>} : memref<8x128xf32, #tpu.memory_space<vmem>>, vector<8x128xf32>,
    return
  }
  func.func @transform_0(%arg0: i32) -> (i32, i32, i32) {
    %c0_i32 = arith.constant 0 : i32
    %c0_i32_0 = arith.constant 0 : i32
    %c0_i32_1 = arith.constant 0 : i32
    return %arg0, %c0_i32, %c0_i32_0 : i32, i32, i32
  }
  func.func @transform_1(%arg0: i32) -> (i32, i32) {
    %c0_i32 = arith.constant 0 : i32
    %c0_i32_0 = arith.constant 0 : i32
    %c0_i32_1 = arith.constant 0 : i32
    return %c0_i32, %c0_i32_0 : i32, i32
  }
  func.func @transform_2(%arg0: i32) -> (i32, i32) {
    %c0_i32 = arith.constant 0 : i32
    %c0_i32_0 = arith.constant 0 : i32
    %c0_i32_1 = arith.constant 0 : i32
    return %c0_i32, %c0_i32_0 : i32, i32
  }
  func.func @transform_3(%arg0: i32) -> (i32, i32) {
    %c0_i32 = arith.constant 0 : i32
    %c0_i32_0 = arith.constant 0 : i32
    %c0_i32_1 = arith.constant 0 : i32
    return %c0_i32, %c0_i32_0 : i32, i32
  }
  func.func @transform_4(%arg0: i32) -> (i32, i32) {
    %c0_i32 = arith.constant 0 : i32
    %c0_i32_0 = arith.constant 0 : i32
    %c0_i32_1 = arith.constant 0 : i32
    return %c0_i32, %c0_i32_0 : i32, i32
  }
  func.func @transform_5(%arg0: i32) -> (i32, i32) {
    %c0_i32 = arith.constant 0 : i32
    %c0_i32_0 = arith.constant 0 : i32
    %c0_i32_1 = arith.constant 0 : i32
    return %c0_i32, %c0_i32_0 : i32, i32
  }
  func.func @transform_6(%arg0: i32) -> (i32, i32) {
    %c0_i32 = arith.constant 0 : i32
    %c0_i32_0 = arith.constant 0 : i32
    %c0_i32_1 = arith.constant 0 : i32
    return %c0_i32, %c0_i32_0 : i32, i32
  }
  func.func @transform_7(%arg0: i32) -> (i32, i32) {
    %c0_i32 = arith.constant 0 : i32
    %c0_i32_0 = arith.constant 0 : i32
    %c0_i32_1 = arith.constant 0 : i32
    return %c0_i32, %c0_i32_0 : i32, i32
  }
  func.func @transform_8(%arg0: i32) -> (i32, i32) {
    %c0_i32 = arith.constant 0 : i32
    %c0_i32_0 = arith.constant 0 : i32
    return %arg0, %c0_i32 : i32, i32
  }
}

</mosaic_0001>

<bundles_post_ra>
// kernel: tpu_custom_call.1
= control target key start
LH: loop header
LB: loop body
LE: loop exit
PB: predicated region body
PF: predicated region fallthrough
CT: control target
= control target key end

     0   :  { %13 = vsyncpa [#allocation3], 0  ;;  %s1531_s0 = inlined_call_operand.vmem [shape: bf16[8,11,16], index: 0, kind: input, shape index: {}]   ;;  %s1532_s1 = inlined_call_operand.hbm [shape: bf16[64,128], index: 1, kind: input, shape index: {}]   ;;  %s1533_s2 = inlined_call_operand.vmem [shape: f32[1,128], index: 2, kind: input, shape index: {}]   ;;  %s1534_s3 = inlined_call_operand.vmem [shape: s32[1,128], index: 3, kind: input, shape index: {}]   ;;  %s1535_s4 = inlined_call_operand.vmem [shape: bf16[128,128], index: 4, kind: input, shape index: {}]   ;;  %s1536_s5 = inlined_call_operand.hbm [shape: f32[1,128], index: 5, kind: input, shape index: {}]   ;;  %s1537_s6 = inlined_call_operand.vmem [shape: bf16[128,128], index: 6, kind: input, shape index: {}]   ;;  %s1538_s7 = inlined_call_operand.vmem [shape: f32[1,128], index: 7, kind: input, shape index: {}]   ;;  %s1539_s8 = inlined_call_operand.hbm [shape: f32[8,128], index: 8, kind: output, shape index: {}]  }
   0x1   :  { %14 = vsyncpa [#allocation6], 0 }
   0x2   :  { %15 = vsyncpa [#allocation4], 0  ;;  %s1124_s27 = smov [#allocation2]   ;;  %s1052_s9 = scalar_lea.hbm %s1532_s1, 512 }
   0x3   :  { %s23_s28 = sshll.u32 %s1124_s27, 4  ;;  %p1053_p0 = scmp.ne.s32.totalorder %s1532_s1, %s1052_s9  ;;  %s24_s28 = int_to_ptr.vmem [resolvable:$true] %s23_s28 }
   0x4   :  { %p1056_p1 = scmp.lt.u32.totalorder %s1052_s9, %s1532_s1 }
   0x6   :  { %p1058_p2 = pnand %p1056_p1, %p1053_p0 }
   0x8   :  { %1061 = shalt.err (!%p1058_p2)
}
   0x9   :  { %s1062_s14 = scalar_lea.vmem %s24_s28, 512  ;;  %p1067_p4 = scmp.lt.s32.totalorder %s24_s28, %s24_s28 }
   0xa   :  { %p1063_p3 = scmp.ne.s32.totalorder %s24_s28, %s1062_s14  ;;  %p1068_p5 = scmp.lt.s32.totalorder %s1062_s14, %s1062_s14 }
   0xc   :  { %p1069_p6 = por %p1068_p5, %p1067_p4 }
   0xe   :  { %p1070_p7 = pnand %p1069_p6, %p1063_p3 }
  0x10   :  { %1073 = shalt.err (!%p1070_p7)
}
  0x11   :  { %s1125_s15 = smov 64   ;;  %s1126_s16 = smov 4  }
  0x12   :  { %29 = dma.hbm_to_vmem [thread:$0]  %s1532_s1, 512, %s24_s28, [#allocation3], %s1125_s15, %s1125_s15, %s1126_s16  }
  0x13   :  { %s1127_s19 = smov [#allocation5]   ;;  %s1074_s23 = scalar_lea.hbm %s1536_s5, 16 }
  0x14   :  { %s42_s20 = sshll.u32 %s1127_s19, 4  ;;  %p1075_p8 = scmp.ne.s32.totalorder %s1536_s5, %s1074_s23  ;;  %s43_s20 = int_to_ptr.vmem [resolvable:$true] %s42_s20 }
  0x15   :  { %p1078_p9 = scmp.lt.u32.totalorder %s1074_s23, %s1536_s5 }
  0x17   :  { %p1080_p10 = pnand %p1078_p9, %p1075_p8 }
  0x19   :  { %1083 = shalt.err (!%p1080_p10)
}
  0x1a   :  { %s1084_s29 = scalar_lea.vmem %s43_s20, 16  ;;  %s1088_s1 = scalar_lea.vmem %s43_s20, 32 }
  0x1b   :  { %p1085_p11 = scmp.ne.s32.totalorder %s43_s20, %s1084_s29  ;;  %p1089_p12 = scmp.lt.s32.totalorder %s43_s20, %s43_s20 }
  0x1c   :  { %p1090_p13 = scmp.lt.s32.totalorder %s1088_s1, %s1084_s29 }
  0x1e   :  { %p1091_p0 = por %p1090_p13, %p1089_p12 }
  0x20   :  { %p1092_p1 = pnand %p1091_p0, %p1085_p11 }
  0x22   :  { %1095 = shalt.err (!%p1092_p1)
}
  0x23   :  { %45 = dma.hbm_to_vmem [thread:$0]  %s1536_s5, 16, %s43_s20, [#allocation6]  }
  0x24   :  { %1118 = dma.done.wait [#allocation3], 512  }
  0x25   :  { %1119 = vsyncadd [#allocation3], 4294966784 }
  0x26   :  { %1120 = dma.done.wait [#allocation6], 16  }
  0x27   :  { %1121 = vsyncadd [#allocation6], 4294967280  ;;  %v1206_v0 = vld [vmem:[%s1531_s0 + $0x8] sm:$0xf]  ;;  %v60_v1 = vld [vmem:[%s1531_s0 + $0xc] sm:$0x3] }
  0x28   :  { %v1214_v2 = vld [vmem:[%s1531_s0] sm:$0xf]  ;;  %v888_v3 = vcombine.low %v1206_v0, %v60_v1  ;;  %v58_v4 = vld [vmem:[%s1531_s0 + $0x4] sm:$0x3]  ;;  %v1223_v5 = vld [vmem:[%s1531_s0 + $0x18] sm:$0xf] }
  0x29   :  { %v64_v6 = vld [vmem:[%s1531_s0 + $0x1c] sm:$0x3]  ;;  %v887_v7 = vcombine.low %v1214_v2, %v58_v4  ;;  %v1233_v9 = vld [vmem:[%s1531_s0 + $0x10] sm:$0xf]  ;;  %v62_v10 = vld [vmem:[%s1531_s0 + $0x14] sm:$0x3] }
  0x2a   :  { %v890_v8 = vcombine.low %v1223_v5, %v64_v6  ;;  %v186_v11 = vrot.slane %v888_v3, 1  ;;  %v1239_v12 = vcombine.low %v1233_v9, %v62_v10  ;;  %v1028_v13 = vld [vmem:[#allocation2] sm:$0xff]   ;;  %s1128_s24 = smov 32   ;;  %v123_v19 = vshll.u32 %v888_v3, 16  ;;  %v1249_v24 = vld [vmem:[%s1531_s0 + $0x28] sm:$0xf] }
  0x2b   :  { %v185_v14 = vrot.slane %v887_v7, 1  ;;  %v116_v15 = vshll.u32 %v887_v7, 16  ;;  %954 = vmatprep.subr.bf16.mxu0 %v1028_v13  ;;  %v114_v21 = vshrl.u32 %v887_v7, 16  ;;  %v68_v25 = vld [vmem:[%s1531_s0 + $0x2c] sm:$0x3]  ;;  %v121_v38 = vshrl.u32 %v888_v3, 16 }
  0x2c   :  { %195 = vrot.lane.b32.xlu1 %v186_v11, %s1128_s24  ;;  %v188_v16 = vrot.slane %v890_v8, 1  ;;  %v128_v17 = vshrl.u32 %v1239_v12, 16  ;;  %v130_v18 = vshll.u32 %v1239_v12, 16  ;;  %v187_v20 = vrot.slane %v1239_v12, 1  ;;  %v1257_v26 = vld [vmem:[%s1531_s0 + $0x20] sm:$0xf]  ;;  %955 = vmatpush3.bf16.msra.mxu0 %v1028_v13 }
  0x2d   :  { %193 = vrot.lane.b32.xlu0 %v185_v14, %s1128_s24  ;;  %v118_v22 = vrot.slane %v116_v15, 1  ;;  %v137_v23 = vshll.u32 %v890_v8, 16  ;;  %v135_v28 = vshrl.u32 %v890_v8, 16  ;;  %v66_v29 = vld [vmem:[%s1531_s0 + $0x24] sm:$0x3]  ;;  %v1029_v36 = vld [vmem:[#allocation2 + $0x8] sm:$0xff]   ;;  %v892_v40 = vcombine.low %v1249_v24, %v68_v25 }
  0x2e   :  { %v132_v27 = vrot.slane %v130_v18, 1  ;;  %v1265_v30 = vld [vmem:[%s1531_s0 + $0x38] sm:$0xf]  ;;  %v72_v31 = vld [vmem:[%s1531_s0 + $0x3c] sm:$0x3]  ;;  %v125_v39 = vrot.slane %v123_v19, 1  ;;  %v1282_v41 = vcombine.low %v1257_v26, %v66_v29  ;;  %956 = vmatprep.subr.bf16.mxu0 %v1029_v36 }
  0x2f   :  { %v1273_v32 = vld [vmem:[%s1531_s0 + $0x30] sm:$0xf]  ;;  %v70_v33 = vld [vmem:[%s1531_s0 + $0x34] sm:$0x3]  ;;  %v139_v35 = vrot.slane %v137_v23, 1  ;;  %v119_v37 = vor.u32 %v118_v22, %v114_v21  ;;  %v1285_v43 = vcombine.low %v1265_v30, %v72_v31  ;;  %s1129_s0 = smov 16  }
  0x30   :  { %199 = vrot.lane.b32.xlu1 %v188_v16, %s1128_s24  ;;  %v133_v34 = vor.u32 %v132_v27, %v128_v17  ;;  %v1030_v42 = vld [vmem:[#allocation2 + $0x10] sm:$0xff]   ;;  %v1288_v44 = vcombine.low %v1273_v32, %v70_v33  ;;  %957 = vmatpush3.bf16.msra.mxu0 %v1029_v36  ;;  %v212_v46 = vrot.slane %v121_v38, 1  ;;  %v213_v47 = vrot.slane %v123_v19, 2  ;;  %v1031_v48 = vld [vmem:[#allocation2 + $0x18] sm:$0xff]   ;;  %s1130_s17 = smov 48   ;;  %s1133_s27 = smov [#allocation7]  }
  0x31   :  { %197 = vrot.lane.b32.xlu0 %v187_v20, %s1128_s24  ;;  %v140_v45 = vor.u32 %v139_v35, %v135_v28  ;;  %958 = vmatprep.subr.bf16.mxu0 %v1030_v42  ;;  %v126_v49 = vor.u32 %v125_v39, %v121_v38  ;;  %v209_v50 = vrot.slane %v114_v21, 1  ;;  %v210_v51 = vrot.slane %v116_v15, 2  ;;  %s877_s29 = sshll.u32 %s1133_s27, 4  ;;  %s878_s29 = int_to_ptr.vmem [resolvable:$true] %s877_s29 }
  0x32   :  { %v151_v52 = vshll.u32 %v892_v40, 16  ;;  %v144_v53 = vshll.u32 %v1282_v41, 16  ;;  %v218_v54 = vrot.slane %v135_v28, 1  ;;  %v219_v55 = vrot.slane %v137_v23, 2  ;;  %s1096_s1 = scalar_lea.vmem %s878_s29, 128  ;;  %p1101_p3 = scmp.lt.s32.totalorder %s878_s29, %s878_s29 }
  0x33   :  { %v165_v56 = vshll.u32 %v1285_v43, 16  ;;  %v158_v57 = vshll.u32 %v1288_v44, 16  ;;  %v214_v58 = vor.u32 %v213_v47, %v212_v46  ;;  %v215_v59 = vrot.slane %v128_v17, 1  ;;  %p1097_p2 = scmp.ne.s32.totalorder %s878_s29, %s1096_s1  ;;  %p1102_p4 = scmp.lt.s32.totalorder %s1096_s1, %s1096_s1 }
  0x34   :  { %173 = vrot.lane.b32.xlu1 %v133_v34, %s1129_s0  ;;  %959 = vmatpush3.bf16.msra.mxu0 %v1030_v42  ;;  %v216_v60 = vrot.slane %v130_v18, 2  ;;  %v211_v61 = vor.u32 %v210_v51, %v209_v50  ;;  %v149_v62 = vshrl.u32 %v892_v40, 16  ;;  %v142_v63 = vshrl.u32 %v1282_v41, 16 }
  0x35   :  { %169 = vrot.lane.b32.xlu0 %v119_v37, %s1129_s0  ;;  %960 = vmatprep.subr.bf16.mxu0 %v1031_v48  ;;  %v153_v1 = vrot.slane %v151_v52, 1  ;;  %v146_v3 = vrot.slane %v144_v53, 1  ;;  %v163_v4 = vshrl.u32 %v1285_v43, 16  ;;  %v156_v6 = vshrl.u32 %v1288_v44, 16  ;;  %p1103_p5 = por %p1102_p4, %p1101_p3 }
  0x36   :  { %v167_v7 = vrot.slane %v165_v56, 1  ;;  %v160_v8 = vrot.slane %v158_v57, 1  ;;  %v220_v10 = vor.u32 %v219_v55, %v218_v54  ;;  %v217_v11 = vor.u32 %v216_v60, %v215_v59 }
  0x37   :  { %v154_v12 = vor.u32 %v153_v1, %v149_v62  ;;  %v147_v13 = vor.u32 %v146_v3, %v142_v63  ;;  %v190_v16 = vrot.slane %v892_v40, 1  ;;  %v189_v17 = vrot.slane %v1282_v41, 1  ;;  %p1104_p6 = pnand %p1103_p5, %p1097_p2 }
  0x38   :  { %175 = vrot.lane.b32.xlu1 %v140_v45, %s1129_s0  ;;  %961 = vmatpush3.bf16.msra.mxu0 %v1031_v48  ;;  %v168_v14 = vor.u32 %v167_v7, %v163_v4  ;;  %v161_v15 = vor.u32 %v160_v8, %v156_v6  ;;  %v192_v18 = vrot.slane %v1285_v43, 1  ;;  %v224_v19 = vrot.slane %v149_v62, 1 }
  0x39   :  { %171 = vrot.lane.b32.xlu0 %v126_v49, %s1129_s0  ;;  %v225_v20 = vrot.slane %v151_v52, 2  ;;  %v191_v21 = vrot.slane %v1288_v44, 1  ;;  %v221_v22 = vrot.slane %v142_v63, 1  ;;  %v222_v23 = vrot.slane %v144_v53, 2 }
  0x3a   :  { %v230_v27 = vrot.slane %v163_v4, 1  ;;  %v231_v28 = vrot.slane %v165_v56, 2  ;;  %v227_v31 = vrot.slane %v156_v6, 1  ;;  %v228_v33 = vrot.slane %v158_v57, 2 }
  0x3b   :  { %v226_v25 = vor.u32 %v225_v20, %v224_v19  ;;  %v223_v29 = vor.u32 %v222_v23, %v221_v22  ;;  %vm249_vm0 = vcmask 130048   ;;  %vm274_vm1 = vcmask 261120   ;;  %v1033_v22 = vld [vmem:[%s1535_s4 + $0x8] sm:$0xff]   ;;  %v1034_v23 = vld [vmem:[%s1535_s4 + $0x10] sm:$0xff]  }
  0x3c   :  { %235 = vrot.lane.b32.xlu1 %v214_v58, %s1130_s17  ;;  %v232_v34 = vor.u32 %v231_v28, %v230_v27  ;;  %v229_v35 = vor.u32 %v228_v33, %v227_v31  ;;  %vm291_vm2 = vcmask 392192   ;;  %vm367_vm3 = vcmask 523264   ;;  %v1036_v27 = vld [vmem:[%s1535_s4 + $0x20] sm:$0xff]   ;;  %v1037_v28 = vld [vmem:[%s1535_s4 + $0x28] sm:$0xff]   ;;  %v1039_v31 = vld [vmem:[%s1535_s4 + $0x38] sm:$0xff]  }
  0x3d   :  { %233 = vrot.lane.b32.xlu0 %v211_v61, %s1130_s17  ;;  %vm1132_vm4 = vmmov 0   ;;  %v453_v33 = vlaneseq  ;;  %vm566_vm6 = vcmask 1041409   ;;  %vm568_vm7 = vcmask 1042434  }
  0x3e   :  { %vm570_vm8 = vcmask 1043459   ;;  %vm572_vm9 = vcmask 1044484   ;;  %vm574_vm10 = vcmask 1045509   ;;  %vm576_vm11 = vcmask 1046534  }
  0x3f   :  { %vm578_vm12 = vcmask 1047559  }
  0x40   :  { %239 = vrot.lane.b32.xlu1 %v220_v10, %s1130_s17 }
  0x41   :  { %237 = vrot.lane.b32.xlu0 %v217_v11, %s1130_s17 }
  0x44   :  { %179 = vrot.lane.b32.xlu1 %v154_v12, %s1129_s0 }
  0x45   :  { %177 = vrot.lane.b32.xlu0 %v147_v13, %s1129_s0 }
  0x48   :  { %183 = vrot.lane.b32.xlu1 %v168_v14, %s1129_s0 }
  0x49   :  { %181 = vrot.lane.b32.xlu0 %v161_v15, %s1129_s0 }
  0x4c   :  { %203 = vrot.lane.b32.xlu1 %v190_v16, %s1128_s24 }
  0x4d   :  { %201 = vrot.lane.b32.xlu0 %v189_v17, %s1128_s24 }
  0x50   :  { %207 = vrot.lane.b32.xlu1 %v192_v18, %s1128_s24 }
  0x51   :  { %205 = vrot.lane.b32.xlu0 %v191_v21, %s1128_s24 }
  0x54   :  { %243 = vrot.lane.b32.xlu1 %v226_v25, %s1130_s17  ;;  %v1035_v25 = vld [vmem:[%s1535_s4 + $0x18] sm:$0xff]  }
  0x55   :  { %241 = vrot.lane.b32.xlu0 %v223_v29, %s1130_s17  ;;  %v1038_v29 = vld [vmem:[%s1535_s4 + $0x30] sm:$0xff]  }
  0x58   :  { %247 = vrot.lane.b32.xlu1 %v232_v34, %s1130_s17  ;;  %v895_v34 = vld [vmem:[%s1533_s2] ss:$0 sm:$0xff] }
  0x59   :  { %245 = vrot.lane.b32.xlu0 %v229_v35, %s1130_s17 }
  0x9e   :  { %v196_v36 = vpop.permute.xlu1 %195 }
  0x9f   :  { %v194_v37 = vpop.permute.xlu0 %193 }
  0xa2   :  { %v200_v38 = vpop.permute.xlu1 %199 }
  0xa3   :  { %v198_v39 = vpop.permute.xlu0 %197 }
  0xa6   :  { %v174_v40 = vpop.permute.xlu1 %173 }
  0xa7   :  { %v170_v41 = vpop.permute.xlu0 %169  ;;  %v258_v52 = vsel %vm249_vm0, %v1233_v9, %v174_v40 }
  0xa8   :  { %v252_v44 = vsel %vm249_vm0, %v1214_v2, %v170_v41 }
  0xa9   :  { %v276_v50 = vsel %vm274_vm1, %v252_v44, %v194_v37  ;;  %v908_v37 = vld [vmem:[%s1534_s3] ss:$0 sm:$0xff] }
  0xaa   :  { %v176_v42 = vpop.permute.xlu1 %175 }
  0xab   :  { %v172_v43 = vpop.permute.xlu0 %171  ;;  %v261_v48 = vsel %vm249_vm0, %v1223_v5, %v176_v42  ;;  %v280_v5 = vsel %vm274_vm1, %v258_v52, %v198_v39 }
  0xac   :  { %v255_v45 = vsel %vm249_vm0, %v1206_v0, %v172_v43  ;;  %v282_v53 = vsel %vm274_vm1, %v261_v48, %v200_v38 }
  0xad   :  { %v278_v47 = vsel %vm274_vm1, %v255_v45, %v196_v36  ;;  %v454_v36 = vshrl.u32 %v453_v33, 7 }
  0xae   :  { %v236_v46 = vpop.permute.xlu1 %235 }
  0xaf   :  { %v295_v49 = vsel %vm291_vm2, %v278_v47, %v236_v46  ;;  %v234_v51 = vpop.permute.xlu0 %233  ;;  %vm1396_vm5 = vcmp.lt.s32.totalorder %v454_v36, %v908_v37 }
  0xb0   :  { %v293_v2 = vsel %vm291_vm2, %v276_v50, %v234_v51 }
  0xb1   :  { %v896_v0 = vcombine.low %v293_v2, %v295_v49 }
  0xb2   :  { %v240_v54 = vpop.permute.xlu1 %239 }
  0xb3   :  { %v299_v55 = vsel %vm291_vm2, %v282_v53, %v240_v54  ;;  %962 = vmatprep.mubr.msk.bf16.mxu0 %vm367_vm3, %v896_v0  ;;  %v238_v56 = vpop.permute.xlu0 %237 }
  0xb4   :  { %v297_v57 = vsel %vm291_vm2, %v280_v5, %v238_v56 }
  0xb5   :  { %v897_v58 = vcombine.low %v297_v57, %v299_v55 }
  0xb6   :  { %v180_v59 = vpop.permute.xlu1 %179 }
  0xb7   :  { %963 = vmatmul.mubr.msk.bf16.vlgmr.msra.gmra.mrb[0].mxu0 %vm367_vm3, %v897_v58  ;;  %v178_v9 = vpop.permute.xlu0 %177  ;;  %v267_v4 = vsel %vm249_vm0, %v1249_v24, %v180_v59 }
  0xb8   :  { %v264_v6 = vsel %vm249_vm0, %v1257_v26, %v178_v9 }
  0xba   :  { %v184_v60 = vpop.permute.xlu1 %183 }
  0xbb   :  { %v182_v61 = vpop.permute.xlu0 %181  ;;  %v273_v14 = vsel %vm249_vm0, %v1265_v30, %v184_v60  ;;  %v1032_v30 = vld [vmem:[%s1535_s4] sm:$0xff]  }
  0xbc   :  { %v270_v24 = vsel %vm249_vm0, %v1273_v32, %v182_v61  ;;  %v1131_v32 = vmov 0.0  }
  0xbd   :  { %970 = vmatprep.subr.bf16.mxu1 %v1131_v32  ;;  %990 = vmatprep.subr.bf16.mxu0 %v1131_v32 }
  0xbe   :  { %v204_v62 = vpop.permute.xlu1 %203  ;;  %971 = vmatpush3.bf16.msra.mxu1 %v1032_v30  ;;  %986 = vmatprep.mubr.msk.bf16.mxu1 %vm1132_vm4, %v1131_v32 }
  0xbf   :  { %v202_v63 = vpop.permute.xlu0 %201  ;;  %v286_v7 = vsel %vm274_vm1, %v267_v4, %v204_v62  ;;  %972 = vmatprep.subr.bf16.mxu1 %v1131_v32 }
  0xc0   :  { %v284_v10 = vsel %vm274_vm1, %v264_v6, %v202_v63 }
  0xc2   :  { %v208_v1 = vpop.permute.xlu1 %207  ;;  %973 = vmatpush3.bf16.msra.mxu1 %v1033_v22 }
  0xc3   :  { %v206_v3 = vpop.permute.xlu0 %205  ;;  %v290_v16 = vsel %vm274_vm1, %v273_v14, %v208_v1  ;;  %974 = vmatprep.subr.bf16.mxu1 %v1131_v32 }
  0xc4   :  { %v288_v17 = vsel %vm274_vm1, %v270_v24, %v206_v3 }
  0xc6   :  { %v244_v8 = vpop.permute.xlu1 %243  ;;  %975 = vmatpush3.bf16.msra.mxu1 %v1034_v23 }
  0xc7   :  { %v303_v11 = vsel %vm291_vm2, %v286_v7, %v244_v8  ;;  %v242_v12 = vpop.permute.xlu0 %241  ;;  %976 = vmatprep.subr.bf16.mxu1 %v1131_v32 }
  0xc8   :  { %v301_v13 = vsel %vm291_vm2, %v284_v10, %v242_v12 }
  0xc9   :  { %v898_v15 = vcombine.low %v301_v13, %v303_v11 }
  0xca   :  { %v248_v26 = vpop.permute.xlu1 %247  ;;  %977 = vmatpush3.bf16.msra.mxu1 %v1035_v25 }
  0xcb   :  { %v307_v18 = vsel %vm291_vm2, %v290_v16, %v248_v26  ;;  %966 = vmatprep.mubr.msk.bf16.mxu0 %vm367_vm3, %v898_v15  ;;  %v246_v19 = vpop.permute.xlu0 %245  ;;  %978 = vmatprep.subr.bf16.mxu1 %v1131_v32 }
  0xcc   :  { %v305_v20 = vsel %vm291_vm2, %v288_v17, %v246_v19 }
  0xcd   :  { %v899_v21 = vcombine.low %v305_v20, %v307_v18 }
  0xce   :  { %979 = vmatpush3.bf16.msra.mxu1 %v1036_v27 }
  0xcf   :  { %967 = vmatmul.mubr.msk.bf16.gmra.mrb[4].mxu0 %vm367_vm3, %v899_v21  ;;  %980 = vmatprep.subr.bf16.mxu1 %v1131_v32 }
  0xd0   :  { %1006 = vmatprep.mubr.msk.bf16.mxu0 %vm1132_vm4, %v1131_v32 }
  0xd2   :  { %981 = vmatpush3.bf16.msra.mxu1 %v1037_v28 }
  0xd3   :  { %982 = vmatprep.subr.bf16.mxu1 %v1131_v32 }
  0xd6   :  { %983 = vmatpush3.bf16.msra.mxu1 %v1038_v29 }
  0xd7   :  { %984 = vmatprep.subr.bf16.mxu1 %v1131_v32 }
  0xda   :  { %985 = vmatpush3.bf16.msra.mxu1 %v1039_v31 }
 0x18a   :  { %v964_v35 = vpop.f32.mrb[0].mxu0 }
 0x18b   :  { %v414_v38 = vpop.f32.mrb[1].mxu0  ;;  %v423_v39 = vadd.f32 %v964_v35, %v895_v34 }
 0x18c   :  { %v415_v40 = vadd.f32 %v895_v34, %v414_v38  ;;  %v965_v41 = vpop.f32.mrb[2].mxu0 }
 0x18d   :  { %v417_v42 = vpop.f32.mrb[3].mxu0  ;;  %v426_v45 = vadd.f32 %v965_v41, %v895_v34  ;;  %v447_v47 = vmax.f32 %v423_v39, 0.0 }
 0x18e   :  { %v445_v44 = vmax.f32 %v415_v40, 0.0  ;;  %v418_v46 = vadd.f32 %v895_v34, %v417_v42 }
 0x18f   :  { %v448_v50 = vmax.f32 %v426_v45, 0.0  ;;  %v465_v2 = vsel %vm1396_vm5, %v447_v47, 0.0 }
 0x190   :  { %v446_v48 = vmax.f32 %v418_v46, 0.0  ;;  %v463_v49 = vsel %vm1396_vm5, %v445_v44, 0.0  ;;  %v483_v55 = vrot.slane %v465_v2, 4 }
 0x191   :  { %v471_v0 = vrot.slane %v463_v49, 4  ;;  %v466_v53 = vsel %vm1396_vm5, %v448_v50, 0.0 }
 0x192   :  { %v464_v51 = vsel %vm1396_vm5, %v446_v48, 0.0  ;;  %v489_v56 = vrot.slane %v466_v53, 4  ;;  %v484_v58 = vmax.f32 %v465_v2, %v483_v55 }
 0x193   :  { %v477_v52 = vrot.slane %v464_v51, 4  ;;  %v472_v5 = vmax.f32 %v463_v49, %v471_v0 }
 0x194   :  { %v490_v9 = vmax.f32 %v466_v53, %v489_v56  ;;  %v485_v61 = vrot.slane %v484_v58, 2 }
 0x195   :  { %v478_v54 = vmax.f32 %v464_v51, %v477_v52  ;;  %v473_v59 = vrot.slane %v472_v5, 2 }
 0x196   :  { %v491_v63 = vrot.slane %v490_v9, 2  ;;  %v486_v4 = vmax.f32 %v484_v58, %v485_v61 }
 0x197   :  { %v479_v57 = vrot.slane %v478_v54, 2  ;;  %v474_v62 = vmax.f32 %v472_v5, %v473_v59 }
 0x198   :  { %v492_v12 = vmax.f32 %v490_v9, %v491_v63  ;;  %v487_v17 = vrot.slane %v486_v4, 1 }
 0x199   :  { %v480_v60 = vmax.f32 %v478_v54, %v479_v57  ;;  %v475_v8 = vrot.slane %v474_v62, 1 }
 0x19a   :  { %v493_v23 = vrot.slane %v492_v12, 1 }
 0x19b   :  { %v481_v1 = vrot.slane %v480_v60, 1  ;;  %v1412_v20 = vmax.f32 %v474_v62, %v475_v8 }
 0x19c   :  { %v1426_v42 = vmax.f32 %v492_v12, %v493_v23 }
 0x19d   :  { %v1408_v24 = vmax.f32 %v480_v60, %v481_v1  ;;  %v519_v37 = vpack.c.bf16 %v1412_v20, %v1412_v20 }
 0x19e   :  { %v522_v0 = vpack.c.bf16 %v1426_v42, %v1426_v42 }
 0x19f   :  { %v520_v28 = vpack.c.bf16 %v1408_v24, %v1408_v24  ;;  %v558_v49 = vunpack.c.l.b16 %v519_v37 }
 0x1a0   :  { %v561_v61 = vunpack.c.l.b16 %v522_v0 }
 0x1a1   :  { %v559_v44 = vunpack.c.l.b16 %v520_v28 }
 0x1a2   :  { %v968_v3 = vpop.f32.mrb[4].mxu0 }
 0x1a3   :  { %v439_v6 = vadd.f32 %v968_v3, %v895_v34  ;;  %v430_v7 = vpop.f32.mrb[5].mxu0  ;;  %v567_v53 = vsel %vm566_vm6, %v559_v44, %v558_v49 }
 0x1a4   :  { %v431_v10 = vadd.f32 %v895_v34, %v430_v7  ;;  %v969_v11 = vpop.f32.mrb[6].mxu0 }
 0x1a5   :  { %v451_v13 = vmax.f32 %v439_v6, 0.0  ;;  %v442_v14 = vadd.f32 %v969_v11, %v895_v34  ;;  %v433_v15 = vpop.f32.mrb[7].mxu0 }
 0x1a6   :  { %v449_v16 = vmax.f32 %v431_v10, 0.0  ;;  %v434_v26 = vadd.f32 %v895_v34, %v433_v15  ;;  %v1422_v34 = vmax.f32 %v486_v4, %v487_v17  ;;  %v1040_v15 = vld [vmem:[%s1537_s6] sm:$0xff]   ;;  %v1043_v17 = vld [vmem:[%s1537_s6 + $0x18] sm:$0xff]  }
 0x1a7   :  { %v469_v18 = vsel %vm1396_vm5, %v451_v13, 0.0  ;;  %v452_v19 = vmax.f32 %v442_v14, 0.0  ;;  %991 = vmatpush3.bf16.msra.mxu0 %v1040_v15 }
 0x1a8   :  { %v507_v21 = vrot.slane %v469_v18, 4  ;;  %v467_v30 = vsel %vm1396_vm5, %v449_v16, 0.0  ;;  %v450_v22 = vmax.f32 %v434_v26, 0.0  ;;  %v521_v43 = vpack.c.bf16 %v1422_v34, %v1422_v34  ;;  %992 = vmatprep.subr.bf16.mxu0 %v1131_v32  ;;  %v1041_v16 = vld [vmem:[%s1537_s6 + $0x8] sm:$0xff]   ;;  %v1042_v26 = vld [vmem:[%s1537_s6 + $0x10] sm:$0xff]  }
 0x1a9   :  { %v495_v25 = vrot.slane %v467_v30, 4  ;;  %v470_v27 = vsel %vm1396_vm5, %v452_v19, 0.0  ;;  %v1045_v19 = vld [vmem:[%s1537_s6 + $0x28] sm:$0xff]  }
 0x1aa   :  { %v508_v29 = vmax.f32 %v469_v18, %v507_v21  ;;  %v513_v31 = vrot.slane %v470_v27, 4  ;;  %v468_v33 = vsel %vm1396_vm5, %v450_v22, 0.0  ;;  %v560_v5 = vunpack.c.l.b16 %v521_v43  ;;  %v1044_v18 = vld [vmem:[%s1537_s6 + $0x20] sm:$0xff]   ;;  %v1046_v21 = vld [vmem:[%s1537_s6 + $0x30] sm:$0xff]  }
 0x1ab   :  { %v496_v35 = vmax.f32 %v467_v30, %v495_v25  ;;  %v501_v36 = vrot.slane %v468_v33, 4  ;;  %993 = vmatpush3.bf16.msra.mxu0 %v1041_v16  ;;  %v1047_v30 = vld [vmem:[%s1537_s6 + $0x38] sm:$0xff]   ;;  %v909_v22 = vld [vmem:[#allocation5] ss:$0 sm:$0xff] }
 0x1ac   :  { %v509_v38 = vrot.slane %v508_v29, 2  ;;  %v514_v39 = vmax.f32 %v470_v27, %v513_v31  ;;  %v569_v60 = vsel %vm568_vm7, %v560_v5, %v567_v53  ;;  %994 = vmatprep.subr.bf16.mxu0 %v1131_v32 }
 0x1ad   :  { %v497_v40 = vrot.slane %v496_v35, 2  ;;  %v502_v41 = vmax.f32 %v468_v33, %v501_v36  ;;  %v571_v4 = vsel %vm570_vm8, %v561_v61, %v569_v60  ;;  %v685_v33 = vsel %vm566_vm6, %v1408_v24, %v1412_v20 }
 0x1ae   :  { %v510_v45 = vmax.f32 %v508_v29, %v509_v38  ;;  %v515_v46 = vrot.slane %v514_v39, 2 }
 0x1af   :  { %v498_v47 = vmax.f32 %v496_v35, %v497_v40  ;;  %v503_v48 = vrot.slane %v502_v41, 2  ;;  %995 = vmatpush3.bf16.msra.mxu0 %v1042_v26  ;;  %v686_v35 = vsel %vm568_vm7, %v1422_v34, %v685_v33 }
 0x1b0   :  { %v511_v50 = vrot.slane %v510_v45, 1  ;;  %v516_v51 = vmax.f32 %v514_v39, %v515_v46  ;;  %996 = vmatprep.subr.bf16.mxu0 %v1131_v32 }
 0x1b1   :  { %v499_v52 = vrot.slane %v498_v47, 1  ;;  %v504_v2 = vmax.f32 %v502_v41, %v503_v48 }
 0x1b2   :  { %v1433_v54 = vmax.f32 %v510_v45, %v511_v50  ;;  %v517_v55 = vrot.slane %v516_v51, 1 }
 0x1b3   :  { %v1435_v56 = vmax.f32 %v498_v47, %v499_v52  ;;  %v505_v57 = vrot.slane %v504_v2, 1  ;;  %997 = vmatpush3.bf16.msra.mxu0 %v1043_v17 }
 0x1b4   :  { %v1437_v58 = vmax.f32 %v516_v51, %v517_v55  ;;  %v525_v62 = vpack.c.bf16 %v1433_v54, %v1433_v54  ;;  %998 = vmatprep.subr.bf16.mxu0 %v1131_v32 }
 0x1b5   :  { %v523_v59 = vpack.c.bf16 %v1435_v56, %v1435_v56  ;;  %v1441_v9 = vmax.f32 %v504_v2, %v505_v57 }
 0x1b6   :  { %v526_v3 = vpack.c.bf16 %v1437_v58, %v1437_v58  ;;  %v564_v8 = vunpack.c.l.b16 %v525_v62 }
 0x1b7   :  { %v562_v63 = vunpack.c.l.b16 %v523_v59  ;;  %v524_v1 = vpack.c.bf16 %v1441_v9, %v1441_v9  ;;  %999 = vmatpush3.bf16.msra.mxu0 %v1044_v18 }
 0x1b8   :  { %v565_v10 = vunpack.c.l.b16 %v526_v3  ;;  %1000 = vmatprep.subr.bf16.mxu0 %v1131_v32 }
 0x1b9   :  { %v563_v6 = vunpack.c.l.b16 %v524_v1  ;;  %v573_v7 = vsel %vm572_vm9, %v562_v63, %v571_v4 }
 0x1bb   :  { %v575_v11 = vsel %vm574_vm10, %v563_v6, %v573_v7  ;;  %1001 = vmatpush3.bf16.msra.mxu0 %v1045_v19 }
 0x1bc   :  { %v577_v12 = vsel %vm576_vm11, %v564_v8, %v575_v11  ;;  %1002 = vmatprep.subr.bf16.mxu0 %v1131_v32 }
 0x1bd   :  { %v579_v13 = vsel %vm578_vm12, %v565_v10, %v577_v12 }
 0x1be   :  { %v580_v14 = vpack.c.b16 %v579_v13, %v579_v13 }
 0x1bf   :  { %1003 = vmatpush3.bf16.msra.mxu0 %v1046_v21 }
 0x1c0   :  { %987 = vmatmul.mubr.bf16.vlgmr.msra.gmra.mrb[0].mxu1 %v580_v14  ;;  %1004 = vmatprep.subr.bf16.mxu0 %v1131_v32  ;;  %v687_v32 = vsel %vm570_vm8, %v1426_v42, %v686_v35 }
 0x1c1   :  { %v688_v38 = vsel %vm572_vm9, %v1435_v56, %v687_v32 }
 0x1c2   :  { %v689_v39 = vsel %vm574_vm10, %v1441_v9, %v688_v38 }
 0x1c3   :  { %1005 = vmatpush3.bf16.msra.mxu0 %v1047_v30  ;;  %v690_v41 = vsel %vm576_vm11, %v1433_v54, %v689_v39 }
 0x1c4   :  { %v691_v44 = vsel %vm578_vm12, %v1437_v58, %v690_v41 }
 0x293   :  { %v664_v23 = vpop.f32.mrb[0].mxu1 }
 0x294   :  { %v665_v25 = vadd.f32 %v909_v22, %v664_v23  ;;  %v988_v27 = vpop.f32.mrb[1].mxu1 }
 0x295   :  { %v667_v28 = vpop.f32.mrb[2].mxu1 }
 0x296   :  { %v918_v29 = vmul.f32 -1.442695, %v665_v25  ;;  %v989_v31 = vpop.f32.mrb[3].mxu1  ;;  %v676_v40 = vmax.f32 %v665_v25, 0.0  ;;  %v919_v25 = vld [vmem:[%s1538_s7] ss:$0 sm:$0xff] }
 0x298   :  { %1048 = vpow2.f32 %v918_v29  ;;  %v693_v45 = vsub.f32 %v676_v40, %v691_v44 }
 0x2a2   :  { %v1049_v36 = vpop.eup %1048 }
 0x2a3   :  { %v673_v37 = vadd.f32 1.0, %v1049_v36 }
 0x2a5   :  { %1050 = vrcp.f32 %v673_v37 }
 0x2af   :  { %v1051_v46 = vpop.eup %1050 }
 0x2b0   :  { %v694_v43 = vmul.f32 %v1051_v46, %v693_v45 }
 0x2b2   :  { %v696_v47 = vrot.slane %v694_v43, 1  ;;  %v697_v48 = vrot.slane %v694_v43, 2  ;;  %v698_v49 = vrot.slane %v694_v43, 3  ;;  %v699_v50 = vrot.slane %v694_v43, 4 }
 0x2b3   :  { %v700_v51 = vrot.slane %v694_v43, 5  ;;  %v701_v52 = vrot.slane %v694_v43, 6  ;;  %v702_v2 = vrot.slane %v694_v43, 7  ;;  %v711_v0 = vadd.f32 %v694_v43, %v1412_v20 }
 0x2b4   :  { %v712_v53 = vadd.f32 %v696_v47, %v1408_v24  ;;  %v713_v55 = vadd.f32 %v697_v48, %v1422_v34  ;;  %v714_v5 = vadd.f32 %v698_v49, %v1426_v42  ;;  %v715_v57 = vadd.f32 %v699_v50, %v1435_v56 }
 0x2b5   :  { %v716_v59 = vadd.f32 %v700_v51, %v1441_v9  ;;  %v717_v60 = vadd.f32 %v701_v52, %v1433_v54  ;;  %v718_v61 = vadd.f32 %v702_v2, %v1437_v58  ;;  %v719_v62 = vpack.c.bf16 %v711_v0, %v711_v0 }
 0x2b6   :  { %v720_v63 = vpack.c.bf16 %v712_v53, %v712_v53  ;;  %v721_v1 = vpack.c.bf16 %v713_v55, %v713_v55  ;;  %v722_v3 = vpack.c.bf16 %v714_v5, %v714_v5  ;;  %v723_v4 = vpack.c.bf16 %v715_v57, %v715_v57 }
 0x2b7   :  { %v724_v20 = vpack.c.bf16 %v716_v59, %v716_v59  ;;  %v725_v6 = vpack.c.bf16 %v717_v60, %v717_v60  ;;  %v726_v24 = vpack.c.bf16 %v718_v61, %v718_v61  ;;  %v758_v10 = vunpack.c.l.b16 %v719_v62 }
 0x2b8   :  { %v759_v7 = vunpack.c.l.b16 %v720_v63  ;;  %v760_v34 = vunpack.c.l.b16 %v721_v1  ;;  %v761_v8 = vunpack.c.l.b16 %v722_v3  ;;  %v762_v42 = vunpack.c.l.b16 %v723_v4 }
 0x2b9   :  { %v763_v56 = vunpack.c.l.b16 %v724_v20  ;;  %v764_v12 = vunpack.c.l.b16 %v725_v6  ;;  %v765_v54 = vunpack.c.l.b16 %v726_v24 }
 0x2ba   :  { %v766_v11 = vrot.slane %v759_v7, 7  ;;  %v768_v9 = vrot.slane %v760_v34, 6  ;;  %v770_v13 = vrot.slane %v761_v8, 5  ;;  %v772_v15 = vrot.slane %v762_v42, 4 }
 0x2bb   :  { %v774_v26 = vrot.slane %v763_v56, 3  ;;  %v776_v18 = vrot.slane %v764_v12, 2  ;;  %v778_v21 = vrot.slane %v765_v54, 1 }
 0x2bc   :  { %v767_v58 = vsel %vm566_vm6, %v766_v11, %v758_v10 }
 0x2bd   :  { %v769_v14 = vsel %vm568_vm7, %v768_v9, %v767_v58 }
 0x2be   :  { %v771_v16 = vsel %vm570_vm8, %v770_v13, %v769_v14 }
 0x2bf   :  { %v773_v17 = vsel %vm572_vm9, %v772_v15, %v771_v16 }
 0x2c0   :  { %v775_v19 = vsel %vm574_vm10, %v774_v26, %v773_v17 }
 0x2c1   :  { %v777_v30 = vsel %vm576_vm11, %v776_v18, %v775_v19 }
 0x2c2   :  { %v779_v22 = vsel %vm578_vm12, %v778_v21, %v777_v30 }
 0x2c3   :  { %v780_v23 = vpack.c.b16 %v779_v22, %v779_v22 }
 0x2c5   :  { %1007 = vmatmul.mubr.bf16.vlgmr.msra.gmra.mrb[8].mxu0 %v780_v23 }
 0x398   :  { %v864_v27 = vpop.f32.mrb[8].mxu0 }
 0x399   :  { %v865_v28 = vadd.f32 %v919_v25, %v864_v27  ;;  %v1008_v29 = vpop.f32.mrb[9].mxu0 }
 0x39a   :  { %v867_v31 = vpop.f32.mrb[10].mxu0 }
 0x39b   :  { %870 = vst [vmem:[#allocation7] sm:$0xff] %v865_v28  ;;  %v1009_v33 = vpop.f32.mrb[11].mxu0 }
 0x39c   :  { %1107 = shalt.err (!%p1104_p6)
}
 0x39d   :  { %s1108_s7 = scalar_lea.hbm %s1539_s8, 128 }
 0x39e   :  { %p1109_p7 = scmp.ne.s32.totalorder %s1539_s8, %s1108_s7  ;;  %p1112_p8 = scmp.lt.u32.totalorder %s1108_s7, %s1539_s8 }
 0x3a0   :  { %p1114_p9 = pnand %p1112_p8, %p1109_p7 }
 0x3a2   :  { %1117 = shalt.err (!%p1114_p9)
}
 0x3a3   :  { %880 = dma.vmem_to_hbm [thread:$0]  %s878_s29, 128, %s1539_s8, [#allocation4]  }
 0x3a4   :  { %1122 = dma.done.wait [#allocation4], 128  }
 0x3a5   :  { %1123 = vsyncadd [#allocation4], 4294967168 }
 0x3a6   :  { %884 = vsyncpa [#allocation3], 1 }
 0x3a7   :  { %885 = vsyncpa [#allocation6], 1 }
 0x3a8   :  { %886 = vsyncpa [#allocation4], 1 }

</bundles_post_ra>
